<compile_context>
chip_gen: v7x
topology: tpu7x:2x2x1
jax: 0.10.0
libtpu: 0.0.40
codegen_flags: <defaults>
</compile_context>

<pallas_src>
import functools

import jax
import jax.numpy as jnp
from jax.experimental import pallas as pl
from jax.experimental.pallas import tpu as pltpu

_MiB = 1024 * 1024
_VMEM_TARGET = 40 * _MiB       # live working-set budget (v7x: 64 MiB physical)
_VMEM_LIMIT_CAP = 48 * _MiB
_RESIDENT_W_BYTES = 24 * _MiB  # max double-buffered weight for the resident path


def _round_up(v, m):
    return ((v + m - 1) // m) * m


def _sublane(dtype):
    # rows per sublane-aligned tile: f32 -> 8, bf16 -> 16, int8/fp8 -> 32
    return {4: 8, 2: 16, 1: 32}.get(jnp.dtype(dtype).itemsize, 8)


def _lr_kernel(x_ref, w_ref, o_ref):
    # One (tm, K) @ (K, tn) MXU matmul per grid step.  The contraction dim is
    # kept full-extent in every path, so accumulation happens inside the MXU in
    # f32 and the result is cast once on the way out (no VMEM accumulator RMW).
    o_ref[...] = jnp.dot(
        x_ref[...], w_ref[...], preferred_element_type=jnp.float32
    ).astype(o_ref.dtype)


@functools.partial(jax.jit, static_argnames=("tm",))
def lr_forward(x, weight, *, tm=None):
    """LR.forward: x.view(-1, input_dim) @ weight.T  (bias=False).

    x:      (..., input_dim)              -> flattened to (M, input_dim)
    weight: (nb_classes, input_dim)        [native PyTorch nn.Linear layout]
    returns (M, nb_classes) in result_type(x, weight)
    """
    N, K = weight.shape
    x2d = x.reshape(-1, K)                      # the x.view(-1, input_dim)
    M = x2d.shape[0]
    out_dtype = jnp.result_type(x2d.dtype, weight.dtype)
    # TODO(synk): integer inputs would accumulate in f32 and cast on store;
    # PyTorch's nn.Linear does not take integer tensors, so this is unspecced.

    xsz = jnp.dtype(x2d.dtype).itemsize
    wsz = jnp.dtype(weight.dtype).itemsize
    osz = jnp.dtype(out_dtype).itemsize
    sub = _sublane(x2d.dtype)

    # --- weight prep (the small operand) ------------------------------------
    # Transpose once in HBM (amortized over every M tile) and pad N up to a
    # 128-multiple so output stores are lane-dense.  x is never padded/copied.
    Np = _round_up(N, 128)
    w_t = weight.T                                   # (K, N), one-time, small
    if Np != N:
        w_t = jnp.pad(w_t, ((0, 0), (0, Np - N)))    # (K, Np), zero columns

    # --- path + tile selection ----------------------------------------------
    w_resident = 2 * K * Np * wsz <= _RESIDENT_W_BYTES
    tn = Np if w_resident else min(Np, 512)
    grid_n = 1 if w_resident else pl.cdiv(Np, tn)

    if tm is None:
        tm = min(_round_up(M, sub), 512)
        if M >= 2 * sub:
            # Keep at least two M blocks so both v7x TensorCores get work.
            tm = min(tm, _round_up(pl.cdiv(M, 2), sub))
    tm = _round_up(max(int(tm), sub), sub)

    def _usage(tm_):
        return (3 * tm_ * K * xsz        # streamed x (up to 3 pipeline buffers)
                + 2 * K * tn * wsz       # weight tile(s)
                + 2 * tm_ * tn * osz)    # output tile

    while tm > sub and _usage(tm) > _VMEM_TARGET:
        tm = _round_up(tm // 2, sub)
    # TODO(synk): a K-tiled 3-D accumulator path would be needed if even a
    # (sub, K) strip of x overflows VMEM (input_dim in the hundreds of
    # thousands); out of scope for an LR head.

    grid_m = pl.cdiv(M, tm)
    x_kwargs = {"pipeline_mode": pl.Buffered(3)} if grid_m >= 4 else {}

    if w_resident:
        grid = (grid_m,)
        in_specs = [
            pl.BlockSpec((tm, K), lambda i: (i, 0), **x_kwargs),
            pl.BlockSpec((K, Np), lambda i: (0, 0)),       # VMEM-resident weight
        ]
        out_spec = pl.BlockSpec((tm, Np), lambda i: (i, 0))
        dim_sem = ("parallel",)
    else:
        grid = (grid_m, grid_n)
        in_specs = [
            pl.BlockSpec((tm, K), lambda i, j: (i, 0), **x_kwargs),
            pl.BlockSpec((K, tn), lambda i, j: (0, j)),
        ]
        out_spec = pl.BlockSpec((tm, tn), lambda i, j: (i, j))
        dim_sem = ("parallel", "parallel")

    weight_fetches = 1 if w_resident else grid_m
    cost = pl.CostEstimate(
        flops=2 * M * Np * K,
        bytes_accessed=(M * K * xsz
                        + weight_fetches * K * Np * wsz
                        + M * Np * osz),
        transcendentals=0,
    )
    vmem_limit = int(min(max(2 * _usage(tm), 16 * _MiB), _VMEM_LIMIT_CAP))

    out = pl.pallas_call(
        _lr_kernel,
        out_shape=jax.ShapeDtypeStruct((M, Np), out_dtype),
        grid_spec=pltpu.PrefetchScalarGridSpec(
            num_scalar_prefetch=0,
            grid=grid,
            in_specs=in_specs,
            out_specs=out_spec,
        ),
        compiler_params=pltpu.CompilerParams(
            dimension_semantics=dim_sem,
            vmem_limit_bytes=vmem_limit,
        ),
        cost_estimate=cost,
    )(x2d, w_t)

    # Strip the N alignment padding (no-op when nb_classes is a 128-multiple).
    return out if Np == N else out[:, :N]


if __name__ == "__main__":
    # Small shapes implied by the module: batch=8, input_dim=32, nb_classes=16.
    batch, input_dim, nb_classes = 8, 32, 16

    key = jax.random.PRNGKey(0)
    kx, kw = jax.random.split(key)

    x = jax.random.normal(kx, (batch, input_dim), dtype=jnp.float32)
    # Deterministic init mimicking nn.Linear's uniform(-1/sqrt(fan_in), 1/sqrt(fan_in)).
    bound = 1.0 / (input_dim ** 0.5)
    weight = jax.random.uniform(
        kw, (nb_classes, input_dim), dtype=jnp.float32, minval=-bound, maxval=bound
    )

    y = lr_forward(x, weight)
    jax.block_until_ready(y)

    # Correctness check against plain JAX reference.
    y_ref = x.reshape(-1, input_dim) @ weight.T
    assert y.shape == (batch, nb_classes)
    assert jnp.allclose(y, y_ref, atol=1e-5, rtol=1e-5)

    print("KERNEL_OK")
</pallas_src>

<mosaic_0001>
module attributes {stable_mosaic.version = 11 : i64} {
  func.func @_lr_kernel(%arg0: i32, %arg1: memref<8x32xf32, #tpu.memory_space<vmem>>, %arg2: memref<32x128xf32, #tpu.memory_space<vmem>>, %arg3: memref<8x128xf32, #tpu.memory_space<vmem>>) attributes {dimension_semantics = [#tpu.dimension_semantics<parallel>], iteration_bounds = array<i64: 1>, scalar_prefetch = 0 : i64, scratch_operands = 0 : i64, tpu.core_type = #tpu.core_type<tc>, window_params = [{transform_indices = @transform_0, window_bounds = array<i64: 8, 32>}, {pipeline_mode = #tpu.pipeline_mode<synchronous>, transform_indices = @transform_1, window_bounds = array<i64: 32, 128>}, {transform_indices = @transform_2, window_bounds = array<i64: 8, 128>}]} {
    %c0 = arith.constant 0 : index
    %c0_0 = arith.constant 0 : index
    %0 = vector.load %arg1[%c0, %c0_0] : memref<8x32xf32, #tpu.memory_space<vmem>>, vector<8x32xf32>
    %c0_1 = arith.constant 0 : index
    %c0_2 = arith.constant 0 : index
    %1 = vector.load %arg2[%c0_1, %c0_2] : memref<32x128xf32, #tpu.memory_space<vmem>>, vector<32x128xf32>
    %cst = arith.constant dense<0.000000e+00> : vector<8x128xf32>
    %2 = tpu.matmul %0, %1, %cst {dimension_numbers = #tpu.dot_dimension_numbers<[1], [0], [0], [1], [0, 0, 1, 1], [], []>} : vector<8x32xf32>, vector<32x128xf32>, vector<8x128xf32> -> vector<8x128xf32>
    %c0_3 = arith.constant 0 : index
    %c0_4 = arith.constant 0 : index
    %3 = vector.load %arg3[%c0_3, %c0_4] : memref<8x128xf32, #tpu.memory_space<vmem>>, vector<8x128xf32>
    tpu.vector_store %arg3[%c0_3, %c0_4], %2 {strides = array<i32>} : memref<8x128xf32, #tpu.memory_space<vmem>>, vector<8x128xf32>,
    return
  }
  func.func @transform_0(%arg0: i32) -> (i32, i32) {
    %c0_i32 = arith.constant 0 : i32
    %c0_i32_0 = arith.constant 0 : i32
    return %arg0, %c0_i32 : i32, i32
  }
  func.func @transform_1(%arg0: i32) -> (i32, i32) {
    %c0_i32 = arith.constant 0 : i32
    %c0_i32_0 = arith.constant 0 : i32
    %c0_i32_1 = arith.constant 0 : i32
    return %c0_i32, %c0_i32_0 : i32, i32
  }
  func.func @transform_2(%arg0: i32) -> (i32, i32) {
    %c0_i32 = arith.constant 0 : i32
    %c0_i32_0 = arith.constant 0 : i32
    return %arg0, %c0_i32 : i32, i32
  }
}

</mosaic_0001>

<bundles_post_ra>
// kernel: lr_forward.1
= control target key start
LH: loop header
LB: loop body
LE: loop exit
PB: predicated region body
PF: predicated region fallthrough
CT: control target
= control target key end

     0   :  { %v157_v3 = vmov 0.0|0.0   ;;  %vm158_vm0 = vmmov 0   ;;  %v159_v6 = vmov 0.0   ;;  %s203_s0 = inlined_call_operand.vmem [shape: f32[8,32], index: 0, kind: input, shape index: {}]   ;;  %s204_s1 = inlined_call_operand.vmem [shape: f32[32,128], index: 1, kind: input, shape index: {}]   ;;  %s205_s2 = inlined_call_operand.hbm [shape: f32[8,128], index: 2, kind: output, shape index: {}]  }
   0x1   :  { %v13_v0 = vld [vmem:[%s204_s1] sm:$0xff]  ;;  %v14_v1 = vld [vmem:[%s204_s1 + $0x8] sm:$0xff]  ;;  %v15_v2 = vld [vmem:[%s204_s1 + $0x10] sm:$0xff]  ;;  %123 = vmatprep.subr.bf16.mxu0 %v157_v3  ;;  %120 = vmatprep.mubr.msk.f32.mxu0 %vm158_vm0, %v159_v6 }
   0x2   :  { %v124_v4 = vpack.c.bf16 %v14_v1, %v13_v0  ;;  %v16_v5 = vld [vmem:[%s204_s1 + $0x18] sm:$0xff] }
   0x3   :  { %7 = vsyncpa [#allocation3], 0  ;;  %v127_v7 = vpack.c.bf16 %v16_v5, %v15_v2  ;;  %v12_v8 = vld [vmem:[%s203_s0] sm:$0xff]  ;;  %vm17_vm1 = vcmask 261120   ;;  %s160_s19 = smov [#allocation2]  }
   0x4   :  { %125 = vmatpush3.bf16.msra.mxu0 %v124_v4  ;;  %s98_s20 = sshll.u32 %s160_s19, 4  ;;  %s99_s20 = int_to_ptr.vmem [resolvable:$true] %s98_s20 }
   0x5   :  { %126 = vmatprep.subr.bf16.mxu0 %v157_v3  ;;  %s133_s1 = scalar_lea.vmem %s99_s20, 128  ;;  %p138_p1 = scmp.lt.s32.totalorder %s99_s20, %s99_s20 }
   0x6   :  { %p134_p0 = scmp.ne.s32.totalorder %s99_s20, %s133_s1  ;;  %p139_p2 = scmp.lt.s32.totalorder %s133_s1, %s133_s1 }
   0x8   :  { %128 = vmatpush3.bf16.msra.mxu0 %v127_v7  ;;  %p140_p3 = por %p139_p2, %p138_p1 }
   0xa   :  { %p141_p4 = pnand %p140_p3, %p134_p0 }
   0xb   :  { %121 = vmatmul.mubr.msk.f32.vlgmr.msra.gmra.mrb[0].mxu0 %vm17_vm1, %v12_v8 }
  0xde   :  { %v87_v9 = vpop.f32.mrb[0].mxu0 }
  0xdf   :  { %91 = vst [vmem:[#allocation2] sm:$0xff] %v87_v9  ;;  %v122_v10 = vpop.f32.mrb[1].mxu0 }
  0xe0   :  { %144 = shalt.err (!%p141_p4)
}
  0xe1   :  { %s145_s23 = scalar_lea.hbm %s205_s2, 128 }
  0xe2   :  { %p146_p5 = scmp.ne.s32.totalorder %s205_s2, %s145_s23  ;;  %p149_p6 = scmp.lt.u32.totalorder %s145_s23, %s205_s2 }
  0xe4   :  { %p151_p7 = pnand %p149_p6, %p146_p5 }
  0xe6   :  { %154 = shalt.err (!%p151_p7)
}
  0xe7   :  { %101 = dma.vmem_to_hbm [thread:$0]  %s99_s20, 128, %s205_s2, [#allocation3]  }
  0xe8   :  { %155 = dma.done.wait [#allocation3], 128  }
  0xe9   :  { %156 = vsyncadd [#allocation3], 4294967168 }
  0xea   :  { %105 = vsyncpa [#allocation3], 1 }

</bundles_post_ra>
